<compile_context>
chip_gen: v5e
topology: v5e:2x2
jax: 0.10.0
libtpu: 0.0.40
codegen_flags: <defaults>
</compile_context>

<pallas_src>
import math

import jax
import jax.numpy as jnp
from jax.experimental import pallas as pl
from jax.experimental.pallas import tpu as pltpu

_LANES = 128
_QUARTER_PI = math.pi / 4.0
_SQRT2 = math.sqrt(2.0)


def _sincos_kernel(coeff_ref, x_ref, o_ref):
    # coeff = scale * sqrt(2);  scale*(sin(x)+cos(x)) == coeff * sin(x + pi/4)
    x = x_ref[...].astype(jnp.float32)
    o_ref[...] = (coeff_ref[0] * jnp.sin(x + _QUARTER_PI)).astype(o_ref.dtype)


def sine_cosine(x, scale=1.0, *,
                target_block_bytes=2 << 20,      # ~2 MiB blocks
                min_block_bytes=256 << 10,       # >= 256 KiB / block
                target_grid_steps=8,             # keep the pipeline deep
                min_pallas_elements=1 << 19):    # small tensors -> plain JAX
    """Pallas implementation of SineCosine: scale * (sin(x) + cos(x))."""
    orig_shape = x.shape
    orig_dtype = x.dtype
    n = x.size

    if n == 0:
        return x

    # Works for Python floats and traced JAX scalars alike (no recompile
    # per scale value, no float() on tracers).
    coeff = (jnp.asarray(scale, dtype=jnp.float32) * _SQRT2).reshape((1,))

    def _jax_path(v):
        y = coeff[0] * jnp.sin(v.astype(jnp.float32) + _QUARTER_PI)
        return y.astype(orig_dtype)

    rows = n // _LANES            # number of full 128-lane rows
    # Tiny inputs (or anything that should stay fusable in XLA) -> plain JAX.
    if n < min_pallas_elements or rows == 0:
        return _jax_path(x)

    itemsize = jnp.dtype(orig_dtype).itemsize
    # Sublane packing multiple: 8 rows for 32-bit, 16 for 16-bit, 32 for 8-bit.
    sub = 8 * max(1, 4 // itemsize)

    x_flat = x.reshape(-1)        # free reshape
    n_main = rows * _LANES
    x_main = x_flat if n_main == n else x_flat[:n_main]
    x2d = x_main.reshape(rows, _LANES)

    # --- Row-tile selection -------------------------------------------------
    max_tile = max(sub, (target_block_bytes // (_LANES * itemsize)) // sub * sub)
    min_tile = max(sub, (min_block_bytes // (_LANES * itemsize)) // sub * sub)

    if rows <= sub:
        row_tile = rows                           # single full-extent block
    else:
        # Aim for >= target_grid_steps pipeline steps, bounded by the per-block
        # byte floor/ceiling, never exceeding the (sublane-rounded) row count.
        tile = pl.cdiv(pl.cdiv(rows, target_grid_steps), sub) * sub
        tile = max(tile, min_tile)
        tile = min(tile, max_tile)
        row_tile = min(tile, pl.cdiv(rows, sub) * sub)
        # Prefer an even block count so v7x's two TensorCores stay balanced.
        nblocks = pl.cdiv(rows, row_tile)
        if nblocks > 1 and nblocks % 2 == 1:
            alt = pl.cdiv(pl.cdiv(rows, nblocks + 1), sub) * sub
            if alt >= sub and pl.cdiv(rows, alt) % 2 == 0:
                row_tile = alt

    grid = (pl.cdiv(rows, row_tile),)

    out2d = pl.pallas_call(
        _sincos_kernel,
        out_shape=jax.ShapeDtypeStruct((rows, _LANES), orig_dtype),
        grid_spec=pltpu.PrefetchScalarGridSpec(
            num_scalar_prefetch=1,               # coeff lives in SMEM
            grid=grid,
            in_specs=[pl.BlockSpec((row_tile, _LANES),
                                   lambda i, coeff_ref: (i, 0))],
            out_specs=pl.BlockSpec((row_tile, _LANES),
                                   lambda i, coeff_ref: (i, 0)),
        ),
        compiler_params=pltpu.CompilerParams(
            dimension_semantics=("parallel",),   # megacore split on v7x
            vmem_limit_bytes=32 * 1024 * 1024,
        ),
    )(coeff, x2d)

    out_main = out2d.reshape(n_main)
    if n_main == n:
        return out_main.reshape(orig_shape)

    # Unaligned tail (< 128 elements): plain JAX, no full-tensor pad/slice.
    tail_out = _jax_path(x_flat[n_main:])
    return jnp.concatenate([out_main, tail_out]).reshape(orig_shape)


def sine_cosine_ref(x, scale=1.0):
    return scale * (jnp.sin(x) + jnp.cos(x))


if __name__ == "__main__":
    k0, k1, k2, k3 = jax.random.split(jax.random.PRNGKey(0), 4)
    scale = 1.5

    # Main case: NCHW-style input, forced through the Pallas kernel
    # (128-aligned size -> no pad/slice/concat, single full block).
    x = jax.random.normal(k0, (2, 4, 16, 16), dtype=jnp.float32)
    y = jax.block_until_ready(sine_cosine(x, scale=scale, min_pallas_elements=0))
    y_ref = sine_cosine_ref(x, scale=scale)
    assert y.shape == x.shape and y.dtype == x.dtype
    assert jnp.allclose(y, y_ref, atol=1e-5, rtol=1e-5), "f32 mismatch"

    # Larger input -> multi-block (even) grid.
    x_big = jax.random.normal(k1, (256, 1024), dtype=jnp.float32)
    y_big = jax.block_until_ready(
        sine_cosine(x_big, scale=scale, min_pallas_elements=0))
    assert jnp.allclose(y_big, sine_cosine_ref(x_big, scale=scale),
                        atol=1e-5, rtol=1e-5), "multi-block mismatch"

    # Unaligned element count -> aligned-prefix kernel + plain-JAX tail.
    x_un = jax.random.normal(k2, (7, 33), dtype=jnp.float32)
    y_un = jax.block_until_ready(
        sine_cosine(x_un, scale=scale, min_pallas_elements=0))
    assert jnp.allclose(y_un, sine_cosine_ref(x_un, scale=scale),
                        atol=1e-5, rtol=1e-5), "unaligned mismatch"

    # bf16 input: f32 compute inside the kernel, cast only on store.
    x_bf = jax.random.normal(k3, (4, 8, 32), dtype=jnp.bfloat16)
    y_bf = jax.block_until_ready(
        sine_cosine(x_bf, scale=scale, min_pallas_elements=0))
    ref_bf = sine_cosine_ref(x_bf.astype(jnp.float32), scale=scale)
    assert y_bf.dtype == jnp.bfloat16
    assert jnp.allclose(y_bf.astype(jnp.float32), ref_bf,
                        atol=5e-2, rtol=5e-2), "bf16 mismatch"

    # Traced scale under jit: exercises the SMEM scalar-prefetch path
    # (no float(scale), no per-value recompiles).
    jitted = jax.jit(lambda xx, s: sine_cosine(xx, s, min_pallas_elements=0))
    y_jit = jax.block_until_ready(jitted(x, jnp.float32(scale)))
    assert jnp.allclose(y_jit, y_ref, atol=1e-5, rtol=1e-5), "traced-scale mismatch"

    # Default call on a small input hits the plain-JAX fast path.
    y_fast = sine_cosine(x, scale=scale)
    assert jnp.allclose(y_fast, y_ref, atol=1e-5, rtol=1e-5), "fast-path mismatch"

    print("KERNEL_OK")
</pallas_src>

<mosaic_0001>
module attributes {stable_mosaic.version = 11 : i64} {
  func.func @_sincos_kernel(%arg0: i32, %arg1: memref<1xf32, #tpu.memory_space<smem>>, %arg2: memref<16x128xf32, #tpu.memory_space<vmem>>, %arg3: memref<16x128xf32, #tpu.memory_space<vmem>>) attributes {dimension_semantics = [#tpu.dimension_semantics<parallel>], iteration_bounds = array<i64: 1>, scalar_prefetch = 1 : i64, scratch_operands = 0 : i64, tpu.core_type = #tpu.core_type<tc>, window_params = [{transform_indices = @transform_0, window_bounds = array<i64: 16, 128>}, {transform_indices = @transform_1, window_bounds = array<i64: 16, 128>}]} {
    %c0 = arith.constant 0 : index
    %c0_0 = arith.constant 0 : index
    %0 = vector.load %arg2[%c0, %c0_0] : memref<16x128xf32, #tpu.memory_space<vmem>>, vector<16x128xf32>
    %c0_1 = arith.constant 0 : index
    %1 = memref.load %arg1[%c0_1] : memref<1xf32, #tpu.memory_space<smem>>
    %cst = arith.constant 0.785398185 : f32
    %2 = vector.broadcast %cst : f32 to vector<16x128xf32>
    %3 = arith.addf %0, %2 : vector<16x128xf32>
    %4 = math.sin %3 : vector<16x128xf32>
    %5 = vector.broadcast %1 : f32 to vector<16x128xf32>
    %6 = arith.mulf %5, %4 : vector<16x128xf32>
    %c0_2 = arith.constant 0 : index
    %c0_3 = arith.constant 0 : index
    %7 = vector.load %arg3[%c0_2, %c0_3] : memref<16x128xf32, #tpu.memory_space<vmem>>, vector<16x128xf32>
    tpu.vector_store %arg3[%c0_2, %c0_3], %6 {strides = array<i32>} : memref<16x128xf32, #tpu.memory_space<vmem>>, vector<16x128xf32>,
    return
  }
  func.func @transform_0(%arg0: i32, %arg1: memref<1xf32, #tpu.memory_space<smem>>) -> (i32, i32) {
    %c0_i32 = arith.constant 0 : i32
    %c0_i32_0 = arith.constant 0 : i32
    return %arg0, %c0_i32 : i32, i32
  }
  func.func @transform_1(%arg0: i32, %arg1: memref<1xf32, #tpu.memory_space<smem>>) -> (i32, i32) {
    %c0_i32 = arith.constant 0 : i32
    %c0_i32_0 = arith.constant 0 : i32
    return %arg0, %c0_i32 : i32, i32
  }
}

</mosaic_0001>

<bundles_post_ra>
// kernel: tpu_custom_call.1
= control target key start
LH: loop header
LB: loop body
LE: loop exit
PB: predicated region body
PF: predicated region fallthrough
CT: control target
= control target key end

     0   :  { %8 = vsyncpa [#allocation5], 0  ;;  %s649_s0 = inlined_call_operand.<no memory space> [shape: f32[1], index: 0, kind: input, shape index: {}]   ;;  %s650_s1 = inlined_call_operand.hbm [shape: f32[16,128], index: 1, kind: input, shape index: {}]   ;;  %s651_s2 = inlined_call_operand.hbm [shape: f32[16,128], index: 2, kind: output, shape index: {}]  }
   0x1   :  { %9 = vsyncpa [#allocation6], 0  ;;  %s14_s11 = sshll.u32 %s650_s1, 4  ;;  %s435_s12 = smov [#allocation4]   ;;  %s15_s11 = int_to_ptr.hbm [resolvable:$true] %s14_s11 }
   0x2   :  { %s16_s13 = sshll.u32 %s435_s12, 4  ;;  %s436_s14 = smov 128   ;;  %s17_s13 = int_to_ptr.vmem [resolvable:$true] %s16_s13 }
   0x3   :  { %s437_s15 = smov 8  }
   0x4   :  { %22 = dma.hbm_to_vmem [thread:$0]  %s15_s11, 256, %s17_s13, [#allocation5], %s436_s14, %s436_s14, %s437_s15  }
   0x5   :  { %431 = dma.done.wait [#allocation5], 256  }
   0x6   :  { %432 = vsyncadd [#allocation5], 4294967040  ;;  %v27_v0 = vld [vmem:[#allocation4] sm:$0xff]  ;;  %v28_v1 = vld [vmem:[#allocation4 + $0x8] sm:$0xff]  ;;  %v438_v25 = vmov 683565275  }
   0x7   :  { %v467_v2 = vadd.f32 0.7853982, %v27_v0  ;;  %v469_v3 = vadd.f32 0.7853982, %v28_v1  ;;  %v439_v27 = vmov 2475754826  }
   0x8   :  { %v440_v29 = vmov 2131351028   ;;  %v441_v31 = vmov 2102212464   ;;  %v442_v33 = vmov 920167782  }
   0x9   :  { %v32_v4 = vand.u32 2147483647, %v467_v2  ;;  %v35_v5 = vand.u32 2139095040, %v467_v2  ;;  %v187_v6 = vand.u32 2147483647, %v469_v3  ;;  %v190_v7 = vand.u32 2139095040, %v469_v3 }
   0xa   :  { %v443_v42 = vmov 1326507024   ;;  %s353_s20 = sshll.u32 %s651_s2, 4  ;;  %s354_s20 = int_to_ptr.hbm [resolvable:$true] %s353_s20 }
   0xb   :  { %v36_v8 = vshrl.u32 %v35_v5, 23  ;;  %v39_v9 = vand.u32 8388607, %v32_v4  ;;  %v191_v10 = vshrl.u32 %v190_v7, 23  ;;  %v194_v14 = vand.u32 8388607, %v187_v6 }
   0xd   :  { %v366_v11 = vadd.s32 4294967169, %v36_v8  ;;  %v40_v12 = vor.u32 8388608, %v39_v9  ;;  %v369_v13 = vadd.s32 4294967169, %v191_v10  ;;  %v195_v19 = vor.u32 8388608, %v194_v14 }
   0xf   :  { %v42_v15 = vadd.s32 1, %v366_v11  ;;  %v197_v16 = vadd.s32 1, %v369_v13  ;;  %v479_v18 = vshll.u32 %v40_v12, 8  ;;  %v489_v36 = vshll.u32 %v195_v19, 8 }
  0x11   :  { %vm43_vm0 = vcmp.gt.s32.totalorder %v42_v15, 0  ;;  %vm198_vm1 = vcmp.gt.s32.totalorder %v197_v16, 0  ;;  %v81_v35 = vand.u32 65535, %v479_v18  ;;  %v82_v40 = vshrl.u32 %v479_v18, 16 }
  0x12   :  { %v44_v17 = vsel %vm43_vm0, %v42_v15, 0  ;;  %v199_v21 = vsel %vm198_vm1, %v197_v16, 0 }
  0x13   :  { %v46_v20 = vand.u32 31, %v44_v17  ;;  %v481_v22 = vshrl.u32 %v44_v17, 5  ;;  %v483_v23 = vand.u32 31, %v199_v21  ;;  %v507_v53 = vshrl.u32 %v199_v21, 5 }
  0x15   :  { %v47_v24 = vsub.s32 32, %v46_v20  ;;  %v49_v26 = vshll.u32 %v438_v25, %v46_v20  ;;  %v52_v28 = vshll.u32 %v439_v27, %v46_v20  ;;  %v55_v30 = vshll.u32 %v440_v29, %v46_v20 }
  0x16   :  { %v58_v32 = vshll.u32 %v441_v31, %v46_v20  ;;  %v61_v34 = vshll.u32 %v442_v33, %v46_v20  ;;  %vm64_vm2 = vcmp.lt.s32.totalorder %v481_v22, 1  ;;  %vm67_vm3 = vcmp.lt.s32.totalorder %v481_v22, 4 }
  0x17   :  { %v50_v37 = vshrl.u32 %v439_v27, %v47_v24  ;;  %v53_v38 = vshrl.u32 %v440_v29, %v47_v24  ;;  %v56_v39 = vshrl.u32 %v441_v31, %v47_v24  ;;  %v59_v41 = vshrl.u32 %v442_v33, %v47_v24 }
  0x18   :  { %v62_v43 = vshrl.u32 %v443_v42, %v47_v24  ;;  %v498_v47 = vsub.s32 32, %v483_v23  ;;  %v48_v48 = vshrl.u32 %v438_v25, %v47_v24  ;;  %vm66_vm4 = vcmp.lt.s32.totalorder %v481_v22, 3 }
  0x19   :  { %v51_v44 = vor.u32 %v50_v37, %v49_v26  ;;  %v54_v45 = vor.u32 %v53_v38, %v52_v28  ;;  %v57_v46 = vor.u32 %v56_v39, %v55_v30  ;;  %v60_v49 = vor.u32 %v59_v41, %v58_v32 }
  0x1a   :  { %v63_v50 = vor.u32 %v62_v43, %v61_v34  ;;  %vm65_vm5 = vcmp.lt.s32.totalorder %v481_v22, 2  ;;  %v204_v56 = vshll.u32 %v438_v25, %v483_v23  ;;  %v207_v57 = vshll.u32 %v439_v27, %v483_v23 }
  0x1b   :  { %v72_v51 = vsel %vm64_vm2, %v51_v44, %v54_v45  ;;  %v76_v52 = vsel %vm64_vm2, %v54_v45, %v57_v46  ;;  %v73_v54 = vsel %vm67_vm3, %v60_v49, 920167782  ;;  %v69_v58 = vsel %vm67_vm3, %v57_v46, 2102212464 }
  0x1c   :  { %v77_v55 = vsel %vm67_vm3, %v63_v50, 1326507024  ;;  %v74_v59 = vsel %vm66_vm4, %v57_v46, %v73_v54  ;;  %v205_v61 = vshrl.u32 %v439_v27, %v498_v47  ;;  %v68_v62 = vsel %vm64_vm2, %v48_v48, %v51_v44 }
  0x1d   :  { %v78_v60 = vsel %vm66_vm4, %v60_v49, %v77_v55  ;;  %v75_v63 = vsel %vm65_vm5, %v72_v51, %v74_v59  ;;  %v208_v1 = vshrl.u32 %v440_v29, %v498_v47  ;;  %v70_v10 = vsel %vm66_vm4, %v54_v45, %v69_v58 }
  0x1e   :  { %v79_v0 = vsel %vm65_vm5, %v76_v52, %v78_v60  ;;  %v105_v8 = vand.u32 65535, %v75_v63  ;;  %v106_v9 = vshrl.u32 %v75_v63, 16  ;;  %v532_v11 = vor.u32 %v205_v61, %v204_v56 }
  0x1f   :  { %v83_v5 = vand.u32 65535, %v79_v0  ;;  %v84_v7 = vshrl.u32 %v79_v0, 16  ;;  %v534_v12 = vor.u32 %v208_v1, %v207_v57  ;;  %v210_v13 = vshll.u32 %v440_v29, %v483_v23 }
  0x20   :  { %v211_v17 = vshrl.u32 %v441_v31, %v498_v47  ;;  %v107_v20 = vmul.u32 %v105_v8, %v81_v35  ;;  %v108_v21 = vmul.u32 %v106_v9, %v81_v35  ;;  %v109_v24 = vmul.u32 %v105_v8, %v82_v40 }
  0x21   :  { %v85_v14 = vmul.u32 %v83_v5, %v81_v35  ;;  %v86_v15 = vmul.u32 %v84_v7, %v81_v35  ;;  %v87_v16 = vmul.u32 %v83_v5, %v82_v40  ;;  %v88_v19 = vmul.u32 %v84_v7, %v82_v40 }
  0x22   :  { %v110_v30 = vmul.u32 %v106_v9, %v82_v40  ;;  %v111_v34 = vshll.u32 %v108_v21, 16  ;;  %v112_v37 = vshrl.u32 %v108_v21, 16  ;;  %v113_v38 = vshll.u32 %v109_v24, 16 }
  0x23   :  { %v89_v26 = vshll.u32 %v86_v15, 16  ;;  %v90_v27 = vshrl.u32 %v86_v15, 16  ;;  %v91_v28 = vshll.u32 %v87_v16, 16  ;;  %v92_v32 = vshrl.u32 %v87_v16, 16 }
  0x24   :  { %v114_v39 = vshrl.u32 %v109_v24, 16  ;;  %v213_v41 = vshll.u32 %v441_v31, %v483_v23  ;;  %v444_v43 = vmov 0   ;;  %vm115_vm7 = vc.u32 %v107_v20, %v111_v34 }
  0x25   :  { %vm93_vm6 = vc.u32 %v85_v14, %v89_v26  ;;  %v95_v29 = vadd.s32 %v89_v26, %v85_v14  ;;  %v117_v35 = vadd.s32 %v111_v34, %v107_v20  ;;  %v214_v45 = vshrl.u32 %v442_v33, %v498_v47 }
  0x26   :  { %v94_v44 = vsel %vm93_vm6, 1, %v444_v43  ;;  %v116_v40 = vsel %vm115_vm7, 1, %v444_v43  ;;  %v216_v48 = vshll.u32 %v442_v33, %v483_v23  ;;  %v212_v31 = vor.u32 %v211_v17, %v210_v13 }
  0x27   :  { %v96_v46 = vadd.s32 %v94_v44, %v88_v19  ;;  %vm97_vm8 = vc.u32 %v95_v29, %v91_v28  ;;  %v118_v50 = vadd.s32 %v116_v40, %v110_v30  ;;  %vm119_vm9 = vc.u32 %v117_v35, %v113_v38 }
  0x28   :  { %v98_v49 = vsel %vm97_vm8, 1, %v444_v43  ;;  %v120_v52 = vsel %vm119_vm9, 1, %v444_v43  ;;  %v215_v54 = vor.u32 %v214_v45, %v213_v41  ;;  %v217_v55 = vshrl.u32 %v443_v42, %v498_v47 }
  0x29   :  { %v100_v51 = vadd.s32 %v98_v49, %v96_v46  ;;  %v551_v56 = vadd.s32 %v117_v35, %v113_v38  ;;  %v122_v57 = vadd.s32 %v120_v52, %v118_v50  ;;  %vm219_vm10 = vcmp.lt.s32.totalorder %v507_v53, 1 }
  0x2a   :  { %vm221_vm11 = vcmp.lt.s32.totalorder %v507_v53, 3  ;;  %v218_v33 = vor.u32 %v217_v55, %v216_v48  ;;  %vm220_vm12 = vcmp.lt.s32.totalorder %v507_v53, 2  ;;  %vm222_vm13 = vcmp.lt.s32.totalorder %v507_v53, 4 }
  0x2b   :  { %v101_v23 = vadd.s32 %v100_v51, %v90_v27  ;;  %v71_v58 = vsel %vm65_vm5, %v68_v62, %v70_v10  ;;  %v123_v59 = vadd.s32 %v122_v57, %v112_v37  ;;  %v227_v42 = vsel %vm219_vm10, %v532_v11, %v534_v12 }
  0x2c   :  { %v228_v60 = vsel %vm222_vm13, %v215_v54, 920167782  ;;  %v231_v0 = vsel %vm219_vm10, %v534_v12, %v212_v31  ;;  %v236_v22 = vand.u32 65535, %v489_v36  ;;  %v232_v5 = vsel %vm222_vm13, %v218_v33, 1326507024 }
  0x2d   :  { %v565_v61 = vadd.s32 %v101_v23, %v92_v32  ;;  %v229_v63 = vsel %vm221_vm11, %v212_v31, %v228_v60  ;;  %v124_v62 = vadd.s32 %v123_v59, %v114_v39  ;;  %v237_v7 = vshrl.u32 %v489_v36, 16 }
  0x2e   :  { %v230_v1 = vsel %vm220_vm12, %v227_v42, %v229_v63  ;;  %v125_v8 = vmul.u32 %v479_v18, %v71_v58  ;;  %v233_v9 = vsel %vm221_vm11, %v215_v54, %v232_v5  ;;  %v203_v20 = vshrl.u32 %v438_v25, %v498_v47 }
  0x2f   :  { %vm127_vm14 = vc.u32 %v565_v61, %v551_v56  ;;  %v260_v10 = vand.u32 65535, %v230_v1  ;;  %v128_v13 = vadd.s32 1, %v124_v62  ;;  %v234_v14 = vsel %vm220_vm12, %v231_v0, %v233_v9 }
  0x30   :  { %v261_v15 = vshrl.u32 %v230_v1, 16  ;;  %v238_v16 = vand.u32 65535, %v234_v14  ;;  %v239_v17 = vshrl.u32 %v234_v14, 16  ;;  %v224_v37 = vsel %vm222_vm13, %v212_v31, 2102212464 }
  0x31   :  { %v129_v19 = vsel %vm127_vm14, %v128_v13, %v124_v62  ;;  %v264_v18 = vmul.u32 %v260_v10, %v237_v7  ;;  %v262_v28 = vmul.u32 %v260_v10, %v236_v22  ;;  %v223_v39 = vsel %vm219_vm10, %v203_v20, %v532_v11 }
  0x32   :  { %v263_v21 = vmul.u32 %v261_v15, %v236_v22  ;;  %v130_v24 = vadd.s32 %v129_v19, %v125_v8  ;;  %v240_v26 = vmul.u32 %v238_v16, %v236_v22  ;;  %v241_v27 = vmul.u32 %v239_v17, %v236_v22 }
  0x33   :  { %v242_v30 = vmul.u32 %v238_v16, %v237_v7  ;;  %v243_v38 = vmul.u32 %v239_v17, %v237_v7  ;;  %v265_v25 = vmul.u32 %v261_v15, %v237_v7  ;;  %v268_v47 = vshll.u32 %v264_v18, 16 }
  0x34   :  { %v266_v32 = vshll.u32 %v263_v21, 16  ;;  %v131_v34 = vadd.s32 536870912, %v130_v24  ;;  %v244_v29 = vshll.u32 %v241_v27, 16  ;;  %v225_v45 = vsel %vm221_vm11, %v534_v12, %v224_v37 }
  0x35   :  { %v246_v41 = vshll.u32 %v242_v30, 16  ;;  %v245_v11 = vshrl.u32 %v241_v27, 16  ;;  %v267_v51 = vshrl.u32 %v263_v21, 16  ;;  %v247_v55 = vshrl.u32 %v242_v30, 16 }
  0x36   :  { %v592_v44 = vshrl.u32 %v131_v34, 30  ;;  %vm248_vm15 = vc.u32 %v240_v26, %v244_v29  ;;  %v250_v35 = vadd.s32 %v244_v29, %v240_v26  ;;  %vm270_vm0 = vc.u32 %v262_v28, %v266_v32 }
  0x37   :  { %v249_v46 = vsel %vm248_vm15, 1, %v444_v43  ;;  %v271_v40 = vsel %vm270_vm0, 1, %v444_v43  ;;  %v272_v48 = vadd.s32 %v266_v32, %v262_v28  ;;  %v269_v23 = vshrl.u32 %v264_v18, 16 }
  0x38   :  { %v133_v49 = vshll.u32 %v592_v44, 30  ;;  %v251_v50 = vadd.s32 %v249_v46, %v243_v38  ;;  %vm252_vm1 = vc.u32 %v250_v35, %v246_v41  ;;  %v273_v52 = vadd.s32 %v271_v40, %v265_v25 }
  0x39   :  { %v253_v31 = vsel %vm252_vm1, 1, %v444_v43  ;;  %vm274_vm2 = vc.u32 %v272_v48, %v268_v47  ;;  %v276_v42 = vadd.s32 %v272_v48, %v268_v47  ;;  %v226_v60 = vsel %vm220_vm12, %v223_v39, %v225_v45 }
  0x3a   :  { %v134_v54 = vsub.s32 %v130_v24, %v133_v49  ;;  %v255_v57 = vadd.s32 %v253_v31, %v251_v50  ;;  %v275_v12 = vsel %vm274_vm2, 1, %v444_v43  ;;  %v280_v5 = vmul.u32 %v489_v36, %v226_v60 }
  0x3b   :  { %v277_v33 = vadd.s32 %v275_v12, %v273_v52  ;;  %v126_v43 = vadd.s32 %v551_v56, %v565_v61  ;;  %v156_v30 = vsub.s32 4, %v592_v44  ;;  %vm34_vm7 = vcmp.lt.s32.totalorder %v467_v2, 0 }
  0x3c   :  { %vm135_vm3 = vcmp.lt.s32.totalorder %v134_v54, 0  ;;  %v136_v58 = vsub.s32 0, %v134_v54  ;;  %v256_v59 = vadd.s32 %v255_v57, %v245_v11  ;;  %vm614_vm8 = vcmp.le.f32.partialorder %v32_v4, 0.7853982 }
  0x3d   :  { %v278_v63 = vadd.s32 %v277_v33, %v267_v51  ;;  %v157_v39 = vsel %vm34_vm7, %v156_v30, %v592_v44  ;;  %vm189_vm11 = vcmp.lt.s32.totalorder %v469_v3, 0  ;;  %vm628_vm13 = vcmp.le.f32.partialorder %v187_v6, 0.7853982 }
  0x3e   :  { %v137_v0 = vsel %vm135_vm3, %v136_v58, %v134_v54  ;;  %v257_v22 = vadd.s32 %v256_v59, %v247_v55  ;;  %v159_v45 = vsel %vm614_vm8, 0, %v157_v39  ;;  %vm175_vm15 = vweird.f32 %v467_v2 }
  0x3f   :  { %v138_v62 = vclz %v137_v0  ;;  %v279_v1 = vadd.s32 %v278_v63, %v269_v23  ;;  %v176_v51 = vadd.s32 3, %v159_v45  ;;  %v342_v6 = vstv %s649_s0  ;;  %s445_s0 = smov [#allocation7]  }
  0x40   :  { %vm282_vm4 = vc.u32 %v257_v22, %v276_v42  ;;  %v281_v35 = vadd.s32 %v276_v42, %v257_v22  ;;  %vm330_vm3 = vweird.f32 %v469_v3  ;;  %s351_s17 = sshll.u32 %s445_s0, 4  ;;  %s352_s17 = int_to_ptr.vmem [resolvable:$true] %s351_s17 }
  0x41   :  { %v367_v7 = vadd.s32 4294967294, %v138_v62  ;;  %v283_v8 = vadd.s32 1, %v279_v1  ;;  %v177_v58 = vand.u32 3, %v176_v51 }
  0x43   :  { %vm368_vm5 = vcmp.lt.s32.totalorder %v367_v7, 0  ;;  %v284_v9 = vsel %vm282_vm4, %v283_v8, %v279_v1  ;;  %vm182_vm10 = vcmp.eq.s32.totalorder %v177_v58, 2  ;;  %vm179_vm12 = vcmp.eq.s32.totalorder %v177_v58, 0 }
  0x44   :  { %v141_v10 = vsel %vm368_vm5, 0, %v367_v7  ;;  %v285_v13 = vadd.s32 %v284_v9, %v280_v5  ;;  %vm178_vm14 = vcmp.lt.s32.totalorder %v177_v58, 2 }
  0x45   :  { %v142_v14 = vsub.s32 32, %v141_v10  ;;  %v143_v53 = vshll.u32 %v134_v54, %v141_v10  ;;  %v146_v15 = vsub.s32 4294967266, %v141_v10 }
  0x46   :  { %v286_v16 = vadd.s32 536870912, %v285_v13 }
  0x47   :  { %v144_v17 = vshrl.u32 %v126_v43, %v142_v14  ;;  %v147_v19 = vadd.s32 127, %v146_v15 }
  0x48   :  { %v607_v20 = vshrl.u32 %v286_v16, 30 }
  0x49   :  { %v145_v21 = vor.u32 %v144_v17, %v143_v53  ;;  %v148_v36 = vshll.u32 %v147_v19, 23 }
  0x4a   :  { %v288_v18 = vshll.u32 %v607_v20, 30  ;;  %v311_v8 = vsub.s32 4, %v607_v20 }
  0x4b   :  { %v149_v24 = vor.u32 4788187, %v148_v36  ;;  %v152_v26 = vcvt.s32.f32 %v145_v21 }
  0x4c   :  { %v289_v27 = vsub.s32 %v285_v13, %v288_v18  ;;  %v312_v15 = vsel %vm189_vm11, %v311_v8, %v607_v20 }
  0x4d   :  { %v150_v56 = vand.u32 2147483647, %v149_v24  ;;  %v314_v36 = vsel %vm628_vm13, 0, %v312_v15 }
  0x4e   :  { %vm290_vm6 = vcmp.lt.s32.totalorder %v289_v27, 0  ;;  %v291_v61 = vsub.s32 0, %v289_v27  ;;  %v331_v20 = vadd.s32 3, %v314_v36 }
  0x4f   :  { %v153_v28 = vmul.f32 %v152_v26, %v150_v56 }
  0x50   :  { %v292_v32 = vsel %vm290_vm6, %v291_v61, %v289_v27 }
  0x51   :  { %v154_v37 = vxor.u32 2147483648, %v153_v28  ;;  %v293_v38 = vclz %v292_v32  ;;  %v332_v32 = vand.u32 3, %v331_v20 }
  0x53   :  { %v155_v29 = vsel %vm34_vm7, %v154_v37, %v153_v28  ;;  %v370_v41 = vadd.s32 4294967294, %v293_v38  ;;  %vm337_vm0 = vcmp.eq.s32.totalorder %v332_v32, 2  ;;  %vm334_vm1 = vcmp.eq.s32.totalorder %v332_v32, 0 }
  0x54   :  { %v158_v25 = vsel %vm614_vm8, %v467_v2, %v155_v29  ;;  %vm333_vm2 = vcmp.lt.s32.totalorder %v332_v32, 2 }
  0x55   :  { %v160_v47 = vmul.f32 %v158_v25, %v158_v25  ;;  %vm371_vm9 = vcmp.lt.s32.totalorder %v370_v41, 0 }
  0x56   :  { %v296_v4 = vsel %vm371_vm9, 0, %v370_v41 }
  0x57   :  { %v161_v46 = vmul.f32 -0.001358992, %v160_v47  ;;  %v168_v40 = vmul.f32 -0.00019511016, %v160_v47  ;;  %v297_v48 = vsub.s32 32, %v296_v4  ;;  %v298_v49 = vshll.u32 %v289_v27, %v296_v4 }
  0x58   :  { %v301_v11 = vsub.s32 4294967266, %v296_v4 }
  0x59   :  { %v162_v50 = vadd.f32 0.041655596, %v161_v46  ;;  %v169_v31 = vadd.f32 0.008332121, %v168_v40  ;;  %v299_v44 = vshrl.u32 %v281_v35, %v297_v48 }
  0x5a   :  { %v302_v52 = vadd.s32 127, %v301_v11 }
  0x5b   :  { %v163_v54 = vmul.f32 %v162_v50, %v160_v47  ;;  %v170_v55 = vmul.f32 %v169_v31, %v160_v47  ;;  %v300_v57 = vor.u32 %v299_v44, %v298_v49 }
  0x5c   :  { %v303_v12 = vshll.u32 %v302_v52, 23 }
  0x5d   :  { %v164_v23 = vadd.f32 -0.4999988, %v163_v54  ;;  %v171_v33 = vadd.f32 -0.16666654, %v170_v55  ;;  %v307_v42 = vcvt.s32.f32 %v300_v57 }
  0x5e   :  { %v304_v59 = vor.u32 4788187, %v303_v12 }
  0x5f   :  { %v165_v60 = vmul.f32 %v164_v23, %v160_v47  ;;  %v172_v63 = vmul.f32 %v171_v33, %v160_v47 }
  0x60   :  { %v305_v0 = vand.u32 2147483647, %v304_v59 }
  0x61   :  { %v166_v22 = vadd.f32 1.0, %v165_v60  ;;  %v173_v62 = vadd.f32 1.0, %v172_v63 }
  0x62   :  { %v308_v1 = vmul.f32 %v307_v42, %v305_v0 }
  0x63   :  { %v174_v5 = vmul.f32 %v173_v62, %v158_v25  ;;  %v183_v7 = vxor.u32 2147483648, %v166_v22 }
  0x64   :  { %v309_v9 = vxor.u32 2147483648, %v308_v1 }
  0x65   :  { %v180_v10 = vxor.u32 2147483648, %v174_v5  ;;  %v184_v13 = vsel %vm182_vm10, %v183_v7, %v174_v5 }
  0x66   :  { %v310_v14 = vsel %vm189_vm11, %v309_v9, %v308_v1 }
  0x67   :  { %v181_v53 = vsel %vm179_vm12, %v166_v22, %v180_v10  ;;  %v313_v16 = vsel %vm628_vm13, %v469_v3, %v310_v14 }
  0x68   :  { %v185_v17 = vsel %vm178_vm14, %v181_v53, %v184_v13  ;;  %v315_v19 = vmul.f32 %v313_v16, %v313_v16 }
  0x69   :  { %v186_v21 = vsel %vm175_vm15, nan, %v185_v17 }
  0x6a   :  { %v316_v18 = vmul.f32 -0.001358992, %v315_v19  ;;  %v323_v2 = vmul.f32 -0.00019511016, %v315_v19  ;;  %v343_v24 = vmul.f32 %v342_v6, %v186_v21 }
  0x6c   :  { %v317_v26 = vadd.f32 0.041655596, %v316_v18  ;;  %v324_v27 = vadd.f32 0.008332121, %v323_v2  ;;  %345 = vst [vmem:[#allocation7] sm:$0xff] %v343_v24 }
  0x6e   :  { %v318_v56 = vmul.f32 %v317_v26, %v315_v19  ;;  %v325_v61 = vmul.f32 %v324_v27, %v315_v19 }
  0x70   :  { %v319_v28 = vadd.f32 -0.4999988, %v318_v56  ;;  %v326_v30 = vadd.f32 -0.16666654, %v325_v61 }
  0x72   :  { %v320_v34 = vmul.f32 %v319_v28, %v315_v19  ;;  %v327_v37 = vmul.f32 %v326_v30, %v315_v19 }
  0x74   :  { %v321_v38 = vadd.f32 1.0, %v320_v34  ;;  %v328_v29 = vadd.f32 1.0, %v327_v37 }
  0x76   :  { %v329_v39 = vmul.f32 %v328_v29, %v313_v16  ;;  %v338_v41 = vxor.u32 2147483648, %v321_v38 }
  0x78   :  { %v335_v25 = vxor.u32 2147483648, %v329_v39  ;;  %v339_v47 = vsel %vm337_vm0, %v338_v41, %v329_v39 }
  0x7a   :  { %v336_v35 = vsel %vm334_vm1, %v321_v38, %v335_v25 }
  0x7b   :  { %v340_v45 = vsel %vm333_vm2, %v336_v35, %v339_v47 }
  0x7c   :  { %v341_v4 = vsel %vm330_vm3, nan, %v340_v45 }
  0x7d   :  { %v344_v46 = vmul.f32 %v342_v6, %v341_v4 }
  0x7f   :  { %346 = vst [vmem:[#allocation7 + $0x8] sm:$0xff] %v344_v46 }
  0x80   :  { %359 = dma.vmem_to_hbm [thread:$0]  %s352_s17, 256, %s354_s20, [#allocation6], %s436_s14, %s436_s14, %s437_s15  }
  0x81   :  { %433 = dma.done.wait [#allocation6], 256  }
  0x82   :  { %434 = vsyncadd [#allocation6], 4294967040 }
  0x83   :  { %364 = vsyncpa [#allocation5], 1 }
  0x84   :  { %365 = vsyncpa [#allocation6], 1 }

</bundles_post_ra>
